<compile_context>
chip_gen: v7x
topology: tpu7x:2x2x1
jax: 0.10.0
libtpu: 0.0.40
codegen_flags: <defaults>
</compile_context>

<pallas_src>
import math

import jax
import jax.numpy as jnp
from jax.experimental import pallas as pl
from jax.experimental.pallas import tpu as pltpu

_LANE = 128


def _round_up(x: int, m: int) -> int:
    return ((x + m - 1) // m) * m


def _choose_graph_tiling(n: int):
    """Returns (padded N, row tile TM, contraction tile TK)."""
    n_pad = _round_up(max(n, 1), _LANE)
    if n_pad <= 512:
        # Small graph: single tile per axis (still lane/sublane aligned).
        return n_pad, n_pad, n_pad
    # Large graph: pad to a multiple of 512 so both tiles divide evenly.
    n_pad = _round_up(n, 512)
    return n_pad, 256, 512


# ---------------------------------------------------------------------------
# Kernels
# ---------------------------------------------------------------------------

def _proj_kernel(h_ref, wt_ref, p_ref):
    # P = H @ Wt   (MXU, f32 accumulate, stored in compute dtype)
    p_ref[...] = jnp.dot(
        h_ref[...], wt_ref[...], preferred_element_type=jnp.float32
    ).astype(p_ref.dtype)


def _agg_kernel(a_ref, p_ref, b_ref, o_ref, acc_ref):
    # out = relu(A @ P + b), accumulated over the contraction (grid axis 1).
    k = pl.program_id(1)

    @pl.when(k == 0)
    def _():
        acc_ref[...] = jnp.zeros_like(acc_ref)

    acc_ref[...] += jnp.dot(
        a_ref[...], p_ref[...], preferred_element_type=jnp.float32
    )

    @pl.when(k == pl.num_programs(1) - 1)
    def _():
        o_ref[...] = jnp.maximum(acc_ref[...] + b_ref[...], 0.0).astype(o_ref.dtype)


# ---------------------------------------------------------------------------
# Wrappers
# ---------------------------------------------------------------------------

def _project(h, wt, *, tm, compute_dtype):
    """P = H @ Wt (no bias / activation), tiled over rows of H."""
    n, d_in = h.shape
    d_out = wt.shape[1]
    itemsize = jnp.dtype(compute_dtype).itemsize
    cost = pl.CostEstimate(
        flops=2 * n * d_in * d_out,
        transcendentals=0,
        bytes_accessed=(n * d_in + d_in * d_out + n * d_out) * itemsize,
    )
    return pl.pallas_call(
        _proj_kernel,
        out_shape=jax.ShapeDtypeStruct((n, d_out), compute_dtype),
        grid_spec=pltpu.PrefetchScalarGridSpec(
            num_scalar_prefetch=0,
            grid=(n // tm,),
            in_specs=[
                pl.BlockSpec((tm, d_in), lambda i: (i, 0)),      # H rows
                pl.BlockSpec((d_in, d_out), lambda i: (0, 0)),   # W.T (hoisted)
            ],
            out_specs=pl.BlockSpec((tm, d_out), lambda i: (i, 0)),
        ),
        compiler_params=pltpu.CompilerParams(
            dimension_semantics=("parallel",),
            vmem_limit_bytes=32 * 1024 * 1024,
        ),
        cost_estimate=cost,
    )(h.astype(compute_dtype), wt.astype(compute_dtype))


def _aggregate(adj_c, p, b2, *, tm, tk):
    """out = relu(A @ P + b), tiled over (row tiles, contraction tiles)."""
    n = adj_c.shape[0]
    d_out = p.shape[1]
    cost = pl.CostEstimate(
        flops=2 * n * n * d_out,
        transcendentals=0,
        bytes_accessed=(
            n * n * adj_c.dtype.itemsize
            + (n // tm) * n * d_out * p.dtype.itemsize
            + n * d_out * 4
        ),
    )
    return pl.pallas_call(
        _agg_kernel,
        out_shape=jax.ShapeDtypeStruct((n, d_out), jnp.float32),
        grid_spec=pltpu.PrefetchScalarGridSpec(
            num_scalar_prefetch=0,
            grid=(n // tm, n // tk),
            in_specs=[
                pl.BlockSpec((tm, tk), lambda i, k: (i, k)),      # A tile
                pl.BlockSpec((tk, d_out), lambda i, k: (k, 0)),   # P tile
                pl.BlockSpec((1, d_out), lambda i, k: (0, 0)),    # bias
            ],
            out_specs=pl.BlockSpec((tm, d_out), lambda i, k: (i, 0)),
            scratch_shapes=[pltpu.VMEM((tm, d_out), jnp.float32)],
        ),
        compiler_params=pltpu.CompilerParams(
            dimension_semantics=("parallel", "arbitrary"),
            vmem_limit_bytes=32 * 1024 * 1024,
        ),
        cost_estimate=cost,
    )(adj_c, p, b2)


def init_gcn_params(key, dim_input, dim_hidden, num_layers):
    """Deterministic Xavier-uniform weights, zero bias (mirrors the torch init)."""
    params = []
    for layer_idx in range(num_layers):
        d_in = dim_input if layer_idx == 0 else dim_hidden
        d_out = dim_hidden
        key, sub = jax.random.split(key)
        bound = math.sqrt(6.0 / (d_in + d_out))
        w = jax.random.uniform(
            sub, (d_out, d_in), dtype=jnp.float32, minval=-bound, maxval=bound
        )
        b = jnp.zeros((d_out,), dtype=jnp.float32)
        params.append((w, b))
    return params


def gcn_forward(adj, input_embs, params, *, compute_dtype=jnp.bfloat16):
    """GraphConvolutionalNetwork.forward (eval mode, input_embs is 2-D [N, d_in])."""
    assert input_embs is not None and input_embs.ndim == 2
    n = adj.shape[0]
    assert adj.shape == (n, n) and input_embs.shape[0] == n

    n_pad, tm, tk = _choose_graph_tiling(n)
    d_in = input_embs.shape[1]
    d_in_pad = _round_up(max(d_in, 1), _LANE)
    d_hidden = params[0][0].shape[0]

    # Pad once. Zero rows/columns of A contribute nothing to real output rows,
    # zero feature columns contribute nothing to the projection.
    adj_p = (
        jnp.zeros((n_pad, n_pad), compute_dtype)
        .at[:n, :n]
        .set(adj.astype(compute_dtype))
    )
    h = (
        jnp.zeros((n_pad, d_in_pad), jnp.float32)
        .at[:n, :d_in]
        .set(input_embs.astype(jnp.float32))
    )

    for (w, b) in params:
        d_out, d_layer_in = w.shape
        d_out_pad = _round_up(d_out, _LANE)
        d_cur_in_pad = h.shape[1]
        # Hoisted transpose + lane padding of the weight / bias (one-time XLA ops).
        wt = (
            jnp.zeros((d_cur_in_pad, d_out_pad), jnp.float32)
            .at[:d_layer_in, :d_out]
            .set(w.T)
        )
        b2 = jnp.zeros((1, d_out_pad), jnp.float32).at[0, :d_out].set(b)

        # Reassociated: A @ (H @ W.T) == (A @ H) @ W.T
        p = _project(h, wt, tm=tm, compute_dtype=compute_dtype)
        h = _aggregate(adj_p, p, b2, tm=tm, tk=tk)

    return h[:n, :d_hidden]


def gcn_reference(adj, x, params, compute_dtype):
    """Pure-JAX reference mirroring the kernel's mixed-precision path."""
    h = x.astype(jnp.float32)
    for (w, b) in params:
        p = jnp.dot(
            h.astype(compute_dtype),
            w.T.astype(compute_dtype),
            preferred_element_type=jnp.float32,
        ).astype(compute_dtype)
        z = jnp.dot(adj.astype(compute_dtype), p, preferred_element_type=jnp.float32) + b
        h = jnp.maximum(z, 0.0)
    return h


if __name__ == "__main__":
    # Small shapes: 16 nodes, 8 input features, 32 hidden, 2 GCN layers.
    N, DIM_IN, DIM_HID, NUM_LAYERS = 16, 8, 32, 2

    key = jax.random.PRNGKey(0)
    k_adj, k_x, k_params = jax.random.split(key, 3)

    adj = jax.random.uniform(k_adj, (N, N), dtype=jnp.float32)
    x = jax.random.normal(k_x, (N, DIM_IN), dtype=jnp.float32)
    params = init_gcn_params(k_params, DIM_IN, DIM_HID, NUM_LAYERS)

    out = gcn_forward(adj, x, params)
    out = jax.block_until_ready(out)

    ref = gcn_reference(adj, x, params, jnp.bfloat16)
    assert out.shape == (N, DIM_HID)
    assert jnp.allclose(out, ref, atol=1e-2, rtol=1e-2), float(
        jnp.max(jnp.abs(out - ref))
    )

    print("KERNEL_OK")
</pallas_src>

<mosaic_0001>
module attributes {stable_mosaic.version = 11 : i64} {
  func.func @_proj_kernel(%arg0: i32, %arg1: memref<128x128xbf16, #tpu.memory_space<vmem>>, %arg2: memref<128x128xbf16, #tpu.memory_space<vmem>>, %arg3: memref<128x128xbf16, #tpu.memory_space<vmem>>) attributes {dimension_semantics = [#tpu.dimension_semantics<parallel>], iteration_bounds = array<i64: 1>, scalar_prefetch = 0 : i64, scratch_operands = 0 : i64, tpu.core_type = #tpu.core_type<tc>, window_params = [{transform_indices = @transform_0, window_bounds = array<i64: 128, 128>}, {pipeline_mode = #tpu.pipeline_mode<synchronous>, transform_indices = @transform_1, window_bounds = array<i64: 128, 128>}, {transform_indices = @transform_2, window_bounds = array<i64: 128, 128>}]} {
    %c0 = arith.constant 0 : index
    %c0_0 = arith.constant 0 : index
    %0 = vector.load %arg1[%c0, %c0_0] : memref<128x128xbf16, #tpu.memory_space<vmem>>, vector<128x128xbf16>
    %c0_1 = arith.constant 0 : index
    %c0_2 = arith.constant 0 : index
    %1 = vector.load %arg2[%c0_1, %c0_2] : memref<128x128xbf16, #tpu.memory_space<vmem>>, vector<128x128xbf16>
    %cst = arith.constant dense<0.000000e+00> : vector<128x128xf32>
    %2 = tpu.matmul %0, %1, %cst {dimension_numbers = #tpu.dot_dimension_numbers<[1], [0], [0], [1], [0, 0, 1, 1], [], []>} : vector<128x128xbf16>, vector<128x128xbf16>, vector<128x128xf32> -> vector<128x128xf32>
    %3 = arith.truncf %2 : vector<128x128xf32> to vector<128x128xbf16>
    %c0_3 = arith.constant 0 : index
    %c0_4 = arith.constant 0 : index
    %4 = vector.load %arg3[%c0_3, %c0_4] : memref<128x128xbf16, #tpu.memory_space<vmem>>, vector<128x128xbf16>
    tpu.vector_store %arg3[%c0_3, %c0_4], %3 {strides = array<i32>} : memref<128x128xbf16, #tpu.memory_space<vmem>>, vector<128x128xbf16>,
    return
  }
  func.func @transform_0(%arg0: i32) -> (i32, i32) {
    %c0_i32 = arith.constant 0 : i32
    %c0_i32_0 = arith.constant 0 : i32
    return %arg0, %c0_i32 : i32, i32
  }
  func.func @transform_1(%arg0: i32) -> (i32, i32) {
    %c0_i32 = arith.constant 0 : i32
    %c0_i32_0 = arith.constant 0 : i32
    %c0_i32_1 = arith.constant 0 : i32
    return %c0_i32, %c0_i32_0 : i32, i32
  }
  func.func @transform_2(%arg0: i32) -> (i32, i32) {
    %c0_i32 = arith.constant 0 : i32
    %c0_i32_0 = arith.constant 0 : i32
    return %arg0, %c0_i32 : i32, i32
  }
}

</mosaic_0001>

<bundles_post_ra>
// kernel: tpu_custom_call.1
= control target key start
LH: loop header
LB: loop body
LE: loop exit
PB: predicated region body
PF: predicated region fallthrough
CT: control target
= control target key end

     0   :  { %7 = vsyncpa [#allocation3], 0  ;;  %s681_s0 = inlined_call_operand.hbm [shape: bf16[128,128], index: 0, kind: input, shape index: {}]   ;;  %s682_s1 = inlined_call_operand.hbm [shape: bf16[128,128], index: 1, kind: input, shape index: {}]   ;;  %s683_s2 = inlined_call_operand.hbm [shape: bf16[128,128], index: 2, kind: output, shape index: {}]  }
   0x1   :  { %8 = vsyncpa [#allocation6], 0 }
   0x2   :  { %9 = vsyncpa [#allocation4], 0  ;;  %s616_s9 = smov [#allocation2]   ;;  %s544_s13 = scalar_lea.hbm %s681_s0, 1024 }
   0x3   :  { %s15_s10 = sshll.u32 %s616_s9, 4  ;;  %p545_p0 = scmp.ne.s32.totalorder %s681_s0, %s544_s13  ;;  %s16_s10 = int_to_ptr.vmem [resolvable:$true] %s15_s10 }
   0x4   :  { %p548_p1 = scmp.lt.u32.totalorder %s544_s13, %s681_s0 }
   0x6   :  { %p550_p2 = pnand %p548_p1, %p545_p0 }
   0x8   :  { %553 = shalt.err (!%p550_p2)
}
   0x9   :  { %s554_s18 = scalar_lea.vmem %s16_s10, 1024  ;;  %p559_p4 = scmp.lt.s32.totalorder %s16_s10, %s16_s10 }
   0xa   :  { %p555_p3 = scmp.ne.s32.totalorder %s16_s10, %s554_s18  ;;  %p560_p5 = scmp.lt.s32.totalorder %s554_s18, %s554_s18 }
   0xc   :  { %p561_p6 = por %p560_p5, %p559_p4 }
   0xe   :  { %p562_p7 = pnand %p561_p6, %p555_p3 }
  0x10   :  { %565 = shalt.err (!%p562_p7)
}
  0x11   :  { %s617_s19 = smov 64   ;;  %s618_s20 = smov 4  }
  0x12   :  { %21 = dma.hbm_to_vmem [thread:$0]  %s681_s0, 1024, %s16_s10, [#allocation3], %s617_s19, %s617_s19, %s618_s20  }
  0x13   :  { %s619_s23 = smov [#allocation5]   ;;  %s566_s27 = scalar_lea.hbm %s682_s1, 1024 }
  0x14   :  { %s27_s24 = sshll.u32 %s619_s23, 4  ;;  %p567_p8 = scmp.ne.s32.totalorder %s682_s1, %s566_s27  ;;  %s28_s24 = int_to_ptr.vmem [resolvable:$true] %s27_s24 }
  0x15   :  { %p570_p9 = scmp.lt.u32.totalorder %s566_s27, %s682_s1 }
  0x17   :  { %p572_p10 = pnand %p570_p9, %p567_p8 }
  0x19   :  { %575 = shalt.err (!%p572_p10)
}
  0x1a   :  { %s576_s4 = scalar_lea.vmem %s28_s24, 1024  ;;  %p581_p12 = scmp.lt.s32.totalorder %s28_s24, %s28_s24 }
  0x1b   :  { %p577_p11 = scmp.ne.s32.totalorder %s28_s24, %s576_s4  ;;  %p582_p13 = scmp.lt.s32.totalorder %s576_s4, %s576_s4 }
  0x1d   :  { %p583_p0 = por %p582_p13, %p581_p12 }
  0x1f   :  { %p584_p1 = pnand %p583_p0, %p577_p11 }
  0x21   :  { %587 = shalt.err (!%p584_p1)
}
  0x22   :  { %33 = dma.hbm_to_vmem [thread:$0]  %s682_s1, 1024, %s28_s24, [#allocation6], %s617_s19, %s617_s19, %s618_s20  }
  0x23   :  { %610 = dma.done.wait [#allocation3], 1024  }
  0x24   :  { %611 = vsyncadd [#allocation3], 4294966272 }
  0x25   :  { %612 = dma.done.wait [#allocation6], 1024  }
  0x26   :  { %613 = vsyncadd [#allocation6], 4294966272  ;;  %v528_v0 = vld [vmem:[#allocation5] sm:$0xff]   ;;  %v529_v1 = vld [vmem:[#allocation5 + $0x8] sm:$0xff]   ;;  %s620_s1 = smov [#allocation7]  }
  0x27   :  { %475 = vmatprep.subr.bf16.mxu0 %v528_v0  ;;  %507 = vmatprep.subr.bf16.mxu1 %v528_v0  ;;  %v530_v2 = vld [vmem:[#allocation5 + $0x10] sm:$0xff]   ;;  %v531_v3 = vld [vmem:[#allocation5 + $0x18] sm:$0xff]   ;;  %v536_v4 = vld [vmem:[#allocation2] sm:$0xff]   ;;  %s351_s6 = sshll.u32 %s620_s1, 4  ;;  %s352_s6 = int_to_ptr.vmem [resolvable:$true] %s351_s6 }
  0x28   :  { %476 = vmatpush3.bf16.msra.mxu0 %v528_v0  ;;  %515 = vmatpush3.bf16.msra.mxu1 %v528_v0  ;;  %v537_v5 = vld [vmem:[#allocation2 + $0x20] sm:$0xff]   ;;  %v533_v7 = vld [vmem:[#allocation5 + $0x28] sm:$0xff]   ;;  %v534_v8 = vld [vmem:[#allocation5 + $0x30] sm:$0xff]   ;;  %s588_s7 = scalar_lea.vmem %s352_s6, 1024  ;;  %p593_p3 = scmp.lt.s32.totalorder %s352_s6, %s352_s6 }
  0x29   :  { %477 = vmatprep.subr.bf16.mxu0 %v529_v1  ;;  %508 = vmatprep.subr.bf16.mxu1 %v529_v1  ;;  %v532_v6 = vld [vmem:[#allocation5 + $0x20] sm:$0xff]   ;;  %v535_v9 = vld [vmem:[#allocation5 + $0x38] sm:$0xff]   ;;  %v538_v10 = vld [vmem:[#allocation2 + $0x8] sm:$0xff]   ;;  %p589_p2 = scmp.ne.s32.totalorder %s352_s6, %s588_s7  ;;  %p594_p4 = scmp.lt.s32.totalorder %s588_s7, %s588_s7 }
  0x2a   :  { %491 = vmatprep.mubr.bf16.mxu0 %v536_v4  ;;  %499 = vmatprep.mubr.bf16.mxu1 %v537_v5  ;;  %v539_v11 = vld [vmem:[#allocation2 + $0x28] sm:$0xff]   ;;  %v540_v12 = vld [vmem:[#allocation2 + $0x10] sm:$0xff]   ;;  %v542_v14 = vld [vmem:[#allocation2 + $0x18] sm:$0xff]  }
  0x2b   :  { %v541_v13 = vld [vmem:[#allocation2 + $0x30] sm:$0xff]   ;;  %v543_v15 = vld [vmem:[#allocation2 + $0x38] sm:$0xff]   ;;  %p595_p5 = por %p594_p4, %p593_p3 }
  0x2c   :  { %478 = vmatpush3.bf16.msra.mxu0 %v529_v1  ;;  %516 = vmatpush3.bf16.msra.mxu1 %v529_v1 }
  0x2d   :  { %479 = vmatprep.subr.bf16.mxu0 %v530_v2  ;;  %509 = vmatprep.subr.bf16.mxu1 %v530_v2  ;;  %p596_p6 = pnand %p595_p5, %p589_p2 }
  0x30   :  { %480 = vmatpush3.bf16.msra.mxu0 %v530_v2  ;;  %517 = vmatpush3.bf16.msra.mxu1 %v530_v2 }
  0x31   :  { %481 = vmatprep.subr.bf16.mxu0 %v531_v3  ;;  %510 = vmatprep.subr.bf16.mxu1 %v531_v3 }
  0x34   :  { %482 = vmatpush3.bf16.msra.mxu0 %v531_v3  ;;  %518 = vmatpush3.bf16.msra.mxu1 %v531_v3 }
  0x35   :  { %483 = vmatprep.subr.bf16.mxu0 %v532_v6  ;;  %511 = vmatprep.subr.bf16.mxu1 %v532_v6 }
  0x38   :  { %484 = vmatpush3.bf16.msra.mxu0 %v532_v6  ;;  %519 = vmatpush3.bf16.msra.mxu1 %v532_v6 }
  0x39   :  { %485 = vmatprep.subr.bf16.mxu0 %v533_v7  ;;  %512 = vmatprep.subr.bf16.mxu1 %v533_v7 }
  0x3c   :  { %486 = vmatpush3.bf16.msra.mxu0 %v533_v7  ;;  %520 = vmatpush3.bf16.msra.mxu1 %v533_v7 }
  0x3d   :  { %487 = vmatprep.subr.bf16.mxu0 %v534_v8  ;;  %513 = vmatprep.subr.bf16.mxu1 %v534_v8 }
  0x40   :  { %488 = vmatpush3.bf16.msra.mxu0 %v534_v8  ;;  %521 = vmatpush3.bf16.msra.mxu1 %v534_v8 }
  0x41   :  { %489 = vmatprep.subr.bf16.mxu0 %v535_v9  ;;  %514 = vmatprep.subr.bf16.mxu1 %v535_v9 }
  0x44   :  { %490 = vmatpush3.bf16.msra.mxu0 %v535_v9  ;;  %522 = vmatpush3.bf16.msra.mxu1 %v535_v9 }
  0x47   :  { %492 = vmatmul.mubr.bf16.vlgmr.msra.gmra.mrb[0].mxu0 %v538_v10  ;;  %500 = vmatmul.mubr.bf16.vlgmr.msra.gmra.mrb[0].mxu1 %v539_v11 }
  0x48   :  { %495 = vmatprep.mubr.bf16.mxu0 %v540_v12  ;;  %503 = vmatprep.mubr.bf16.mxu1 %v541_v13 }
  0x4f   :  { %496 = vmatmul.mubr.bf16.gmra.mrb[4].mxu0 %v542_v14  ;;  %504 = vmatmul.mubr.bf16.gmra.mrb[4].mxu1 %v543_v15 }
 0x11a   :  { %v493_v16 = vpop.f32.mrb[0].mxu0  ;;  %v501_v17 = vpop.f32.mrb[0].mxu1 }
 0x11b   :  { %v203_v18 = vpop.f32.mrb[1].mxu0  ;;  %v235_v19 = vpop.f32.mrb[1].mxu1 }
 0x11c   :  { %v494_v20 = vpop.f32.mrb[2].mxu0  ;;  %v502_v21 = vpop.f32.mrb[2].mxu1 }
 0x11d   :  { %v420_v22 = vpack.c.bf16 %v494_v20, %v493_v16  ;;  %v440_v23 = vpack.c.bf16 %v502_v21, %v501_v17  ;;  %v206_v24 = vpop.f32.mrb[3].mxu0  ;;  %v238_v25 = vpop.f32.mrb[3].mxu1 }
 0x11e   :  { %v415_v26 = vpack.c.bf16 %v206_v24, %v203_v18  ;;  %v435_v27 = vpack.c.bf16 %v238_v25, %v235_v19 }
 0x11f   :  { %452 = vst [vmem:[#allocation7 + $0x8] sm:$0xff] %v420_v22   ;;  %456 = vst [vmem:[#allocation7 + $0x28] sm:$0xff] %v440_v23  }
 0x120   :  { %416 = vst [vmem:[#allocation7] sm:$0xff] %v415_v26   ;;  %455 = vst [vmem:[#allocation7 + $0x20] sm:$0xff] %v435_v27  }
 0x122   :  { %v497_v28 = vpop.f32.mrb[4].mxu0  ;;  %v505_v29 = vpop.f32.mrb[4].mxu1 }
 0x123   :  { %v219_v30 = vpop.f32.mrb[5].mxu0  ;;  %v251_v31 = vpop.f32.mrb[5].mxu1 }
 0x124   :  { %v498_v32 = vpop.f32.mrb[6].mxu0  ;;  %v506_v33 = vpop.f32.mrb[6].mxu1 }
 0x125   :  { %v430_v34 = vpack.c.bf16 %v498_v32, %v497_v28  ;;  %v450_v35 = vpack.c.bf16 %v506_v33, %v505_v29  ;;  %v222_v36 = vpop.f32.mrb[7].mxu0  ;;  %v254_v37 = vpop.f32.mrb[7].mxu1 }
 0x126   :  { %v425_v38 = vpack.c.bf16 %v222_v36, %v219_v30  ;;  %v445_v39 = vpack.c.bf16 %v254_v37, %v251_v31 }
 0x127   :  { %454 = vst [vmem:[#allocation7 + $0x18] sm:$0xff] %v430_v34   ;;  %458 = vst [vmem:[#allocation7 + $0x38] sm:$0xff] %v450_v35  }
 0x128   :  { %453 = vst [vmem:[#allocation7 + $0x10] sm:$0xff] %v425_v38   ;;  %457 = vst [vmem:[#allocation7 + $0x30] sm:$0xff] %v445_v39  }
 0x129   :  { %599 = shalt.err (!%p596_p6)
}
 0x12a   :  { %s600_s10 = scalar_lea.hbm %s683_s2, 1024 }
 0x12b   :  { %p601_p7 = scmp.ne.s32.totalorder %s683_s2, %s600_s10  ;;  %p604_p8 = scmp.lt.u32.totalorder %s600_s10, %s683_s2 }
 0x12d   :  { %p606_p9 = pnand %p604_p8, %p601_p7 }
 0x12f   :  { %609 = shalt.err (!%p606_p9)
}
 0x130   :  { %357 = dma.vmem_to_hbm [thread:$0]  %s352_s6, 1024, %s683_s2, [#allocation4], %s617_s19, %s617_s19, %s618_s20  }
 0x131   :  { %614 = dma.done.wait [#allocation4], 1024  }
 0x132   :  { %615 = vsyncadd [#allocation4], 4294966272 }
 0x133   :  { %361 = vsyncpa [#allocation3], 1 }
 0x134   :  { %362 = vsyncpa [#allocation6], 1 }
 0x135   :  { %363 = vsyncpa [#allocation4], 1 }

</bundles_post_ra>
